<compile_context>
chip_gen: v6e
topology: v6e:2x2x1
jax: 0.10.0
libtpu: 0.0.40
codegen_flags: <defaults>
</compile_context>

<pallas_src>
import jax
import jax.numpy as jnp
import numpy as np
from jax.experimental import pallas as pl
from jax.experimental.pallas import tpu as pltpu

NORM_EPS = 1e-5


# --------------------------------------------------------------------------
# Kernel: fused (pool+)conv+BN as  out = W_fold @ x + shift  per lane tile.
# --------------------------------------------------------------------------
def _conv_bn_kernel(x_ref, w_ref, b_ref, o_ref):
    # x_ref: (K, T)   channels-in-contraction x spatial-in-lanes
    # w_ref: (Cout, K) folded weight (pool factor + BN scale already inside)
    # b_ref: (Cout, 1) folded BN shift
    # o_ref: (Cout, T) lane-dense output tile
    y = jnp.dot(w_ref[...], x_ref[...], preferred_element_type=jnp.float32)
    o_ref[...] = (y + b_ref[...]).astype(o_ref.dtype)


def _pick_lane_tile(k, cout, s, itemsize, *, max_tile=8192, vmem_budget=8 * 2**20):
    """Largest lane tile whose double-buffered footprint fits the VMEM budget."""
    fixed = 2 * (k + 1) * cout * itemsize            # resident weight + shift
    per_col = 2 * (k + cout) * itemsize              # double-buffered x + out col
    t = (max(0, vmem_budget - fixed) // per_col) // 128 * 128
    t = max(128, min(max_tile, t))
    return s if s <= t else t                        # full extent if it fits


def _run_conv_bn(x, w, b):
    # x: (N, K, S), w: (Cout, K), b: (Cout, 1)  ->  (N, Cout, S)
    n, k, s = x.shape
    cout = w.shape[0]
    t = _pick_lane_tile(k, cout, s, x.dtype.itemsize)
    return pl.pallas_call(
        _conv_bn_kernel,
        out_shape=jax.ShapeDtypeStruct((n, cout, s), x.dtype),
        grid=(n, pl.cdiv(s, t)),                     # ragged tail handled by Pallas
        in_specs=[
            pl.BlockSpec((None, k, t), lambda i, j: (i, 0, j)),
            pl.BlockSpec((cout, k), lambda i, j: (0, 0)),   # resident across grid
            pl.BlockSpec((cout, 1), lambda i, j: (0, 0)),   # resident across grid
        ],
        out_specs=pl.BlockSpec((None, cout, t), lambda i, j: (i, 0, j)),
        compiler_params=pltpu.CompilerParams(
            dimension_semantics=("parallel", "parallel")),
    )(x, w, b)


# --------------------------------------------------------------------------
# jitted forward paths (NCHW in, NCHW out; reshapes are free)
# --------------------------------------------------------------------------
@jax.jit
def _forward_conv_bn(x, w_fold, shift):
    # stride=1, in != out: 1x1 conv + BN.  Zero wrapper copies.
    n, c, h, w = x.shape
    out = _run_conv_bn(x.reshape(n, c, h * w), w_fold, shift)
    return out.reshape(n, -1, h, w)


@jax.jit
def _forward_pool_conv_bn(x, w_fold, shift):
    # stride=2: 2x2 avgpool + 1x1 conv + BN, pool folded into the contraction.
    n, c, h, w = x.shape
    hp, wp = -(-h // 2), -(-w // 2)                  # ceil_mode output size
    if (h % 2) or (w % 2):
        # count_include_pad=False: scale the last valid row/column by 2 so that
        # (sum of zero-padded 2x2 window) / 4 == sum_valid / count_valid.
        if h % 2:
            x = x.at[:, :, -1, :].multiply(2.0)
        if w % 2:
            x = x.at[:, :, :, -1].multiply(2.0)
        x = jnp.pad(x, ((0, 0), (0, 0), (0, 2 * hp - h), (0, 2 * wp - w)))
    # One rearrangement pass: window corners -> contraction axis (K = 4*Cin),
    # spatial flattened into the lane axis.  The kernel reads this exactly once.
    xr = x.reshape(n, c, hp, 2, wp, 2)
    xs = jnp.transpose(xr, (0, 3, 5, 1, 2, 4)).reshape(n, 4 * c, hp * wp)
    out = _run_conv_bn(xs, w_fold, shift)
    return out.reshape(n, -1, hp, wp)


# --------------------------------------------------------------------------
# Module-equivalent wrapper
# --------------------------------------------------------------------------
class PatchEmbedPallas:
    """JAX/Pallas equivalent of the PyTorch PatchEmbed module (eval-mode BN)."""

    def __init__(self, in_channels, out_channels, stride=1, *, key):
        self.in_channels = in_channels
        self.out_channels = out_channels
        self.stride = stride
        self.identity = (stride != 2 and in_channels == out_channels)
        if self.identity:
            return
        k1, k2, k3, k4, k5 = jax.random.split(key, 5)
        # torch conv weight (Cout, Cin, 1, 1) -> (Cout, Cin)
        self.w_oc = 0.1 * jax.random.normal(
            k1, (out_channels, in_channels), jnp.float32)
        gamma = 1.0 + 0.1 * jax.random.normal(k2, (out_channels,), jnp.float32)
        beta = 0.1 * jax.random.normal(k3, (out_channels,), jnp.float32)
        r_mean = 0.1 * jax.random.normal(k4, (out_channels,), jnp.float32)
        r_var = jnp.abs(1.0 + 0.1 * jax.random.normal(k5, (out_channels,),
                                                      jnp.float32))
        self.scale = gamma / jnp.sqrt(r_var + NORM_EPS)   # eval-mode BN fold
        self.shift = beta - r_mean * self.scale
        if stride == 2:
            # Fold 1/4 (avg pool) and BN scale into a 4-corner-stacked weight.
            self.w_fold = 0.25 * self.scale[:, None] * jnp.tile(self.w_oc, (1, 4))
        else:
            self.w_fold = self.scale[:, None] * self.w_oc
        self.shift_col = self.shift.reshape(out_channels, 1)

    def __call__(self, x_nchw):
        assert x_nchw.shape[1] == self.in_channels
        if self.identity:
            return x_nchw
        if self.stride == 2:
            return _forward_pool_conv_bn(x_nchw, self.w_fold, self.shift_col)
        return _forward_conv_bn(x_nchw, self.w_fold, self.shift_col)


# --------------------------------------------------------------------------
# Pure-jnp reference (exact avgpool semantics: ceil_mode, count_include_pad=False)
# --------------------------------------------------------------------------
def _reference(x, mod):
    if mod.identity:
        return x
    n, c, h, w = x.shape
    if mod.stride == 2:
        hp, wp = -(-h // 2), -(-w // 2)
        xp = jnp.pad(x, ((0, 0), (0, 0), (0, 2 * hp - h), (0, 2 * wp - w)))
        sums = xp.reshape(n, c, hp, 2, wp, 2).sum(axis=(3, 5))
        rc = jnp.minimum(jnp.arange(hp) * 2 + 2, h) - jnp.arange(hp) * 2
        cc = jnp.minimum(jnp.arange(wp) * 2 + 2, w) - jnp.arange(wp) * 2
        cnt = (rc[:, None] * cc[None, :]).astype(x.dtype)
        p = sums / cnt
    else:
        p = x
    y = jnp.einsum('oc,nchw->nohw', mod.w_oc, p)
    return y * mod.scale.reshape(1, -1, 1, 1) + mod.shift.reshape(1, -1, 1, 1)


# --------------------------------------------------------------------------
# Demo / check
# --------------------------------------------------------------------------
if __name__ == "__main__":
    key = jax.random.PRNGKey(0)
    kx, kx2, kp1, kp2 = jax.random.split(key, 4)

    x = jax.random.normal(kx, (2, 4, 16, 16), jnp.float32)

    # stride=2 branch: avgpool + 1x1 conv + BN
    mod2 = PatchEmbedPallas(4, 32, stride=2, key=kp1)
    out2 = jax.block_until_ready(mod2(x))
    assert out2.shape == (2, 32, 8, 8)
    np.testing.assert_allclose(np.asarray(out2), np.asarray(_reference(x, mod2)),
                               rtol=1e-5, atol=1e-5)

    # stride=2 with odd spatial dims (ceil_mode + count_include_pad=False edges)
    x_odd = jax.random.normal(kx2, (2, 4, 15, 13), jnp.float32)
    out2o = jax.block_until_ready(mod2(x_odd))
    assert out2o.shape == (2, 32, 8, 7)
    np.testing.assert_allclose(np.asarray(out2o),
                               np.asarray(_reference(x_odd, mod2)),
                               rtol=1e-5, atol=1e-5)

    # stride=1, in != out branch: 1x1 conv + BN
    mod1 = PatchEmbedPallas(4, 32, stride=1, key=kp2)
    out1 = jax.block_until_ready(mod1(x))
    assert out1.shape == (2, 32, 16, 16)
    np.testing.assert_allclose(np.asarray(out1), np.asarray(_reference(x, mod1)),
                               rtol=1e-5, atol=1e-5)

    # identity branch
    mod_id = PatchEmbedPallas(4, 4, stride=1, key=kp2)
    out_id = jax.block_until_ready(mod_id(x))
    np.testing.assert_allclose(np.asarray(out_id), np.asarray(x))

    print("KERNEL_OK")
</pallas_src>

<mosaic_0001>
module attributes {stable_mosaic.version = 11 : i64} {
  func.func @_conv_bn_kernel(%arg0: i32, %arg1: i32, %arg2: memref<1x16x64xf32, #tpu.memory_space<vmem>>, %arg3: memref<32x16xf32, #tpu.memory_space<vmem>>, %arg4: memref<32x1xf32, #tpu.memory_space<vmem>>, %arg5: memref<1x32x64xf32, #tpu.memory_space<vmem>>) attributes {dimension_semantics = [#tpu.dimension_semantics<parallel>, #tpu.dimension_semantics<parallel>], iteration_bounds = array<i64: 2, 1>, scalar_prefetch = 0 : i64, scratch_operands = 0 : i64, tpu.core_type = #tpu.core_type<tc>, window_params = [{transform_indices = @transform_0, window_bounds = array<i64: 1, 16, 64>}, {pipeline_mode = #tpu.pipeline_mode<synchronous>, transform_indices = @transform_1, window_bounds = array<i64: 32, 16>}, {pipeline_mode = #tpu.pipeline_mode<synchronous>, transform_indices = @transform_2, window_bounds = array<i64: 32, 1>}, {transform_indices = @transform_3, window_bounds = array<i64: 1, 32, 64>}]} {
    %c0 = arith.constant 0 : index
    %c0_0 = arith.constant 0 : index
    %0 = vector.load %arg3[%c0, %c0_0] : memref<32x16xf32, #tpu.memory_space<vmem>>, vector<32x16xf32>
    %c0_1 = arith.constant 0 : index
    %c0_2 = arith.constant 0 : index
    %c0_3 = arith.constant 0 : index
    %1 = vector.load %arg2[%c0_1, %c0_2, %c0_3] : memref<1x16x64xf32, #tpu.memory_space<vmem>>, vector<1x16x64xf32>
    %2 = vector.shape_cast %1 : vector<1x16x64xf32> to vector<16x64xf32>
    %cst = arith.constant dense<0.000000e+00> : vector<32x64xf32>
    %3 = tpu.matmul %0, %2, %cst {dimension_numbers = #tpu.dot_dimension_numbers<[1], [0], [0], [1], [0, 0, 1, 1], [], []>} : vector<32x16xf32>, vector<16x64xf32>, vector<32x64xf32> -> vector<32x64xf32>
    %c0_4 = arith.constant 0 : index
    %c0_5 = arith.constant 0 : index
    %4 = vector.load %arg4[%c0_4, %c0_5] : memref<32x1xf32, #tpu.memory_space<vmem>>, vector<32x1xf32>
    %5 = vector.broadcast %4 : vector<32x1xf32> to vector<32x64xf32>
    %6 = arith.addf %3, %5 : vector<32x64xf32>
    %c0_6 = arith.constant 0 : index
    %c0_7 = arith.constant 0 : index
    %c0_8 = arith.constant 0 : index
    %7 = vector.load %arg5[%c0_6, %c0_7, %c0_8] : memref<1x32x64xf32, #tpu.memory_space<vmem>>, vector<1x32x64xf32>
    %8 = vector.shape_cast %7 : vector<1x32x64xf32> to vector<32x64xf32>
    %9 = vector.shape_cast %6 : vector<32x64xf32> to vector<1x32x64xf32>
    tpu.vector_store %arg5[%c0_6, %c0_7, %c0_8], %9 {strides = array<i32>} : memref<1x32x64xf32, #tpu.memory_space<vmem>>, vector<1x32x64xf32>,
    return
  }
  func.func @transform_0(%arg0: i32, %arg1: i32) -> (i32, i32, i32) {
    %c0_i32 = arith.constant 0 : i32
    %c0_i32_0 = arith.constant 0 : i32
    return %arg0, %c0_i32, %arg1 : i32, i32, i32
  }
  func.func @transform_1(%arg0: i32, %arg1: i32) -> (i32, i32) {
    %c0_i32 = arith.constant 0 : i32
    %c0_i32_0 = arith.constant 0 : i32
    %c0_i32_1 = arith.constant 0 : i32
    return %c0_i32, %c0_i32_0 : i32, i32
  }
  func.func @transform_2(%arg0: i32, %arg1: i32) -> (i32, i32) {
    %c0_i32 = arith.constant 0 : i32
    %c0_i32_0 = arith.constant 0 : i32
    %c0_i32_1 = arith.constant 0 : i32
    return %c0_i32, %c0_i32_0 : i32, i32
  }
  func.func @transform_3(%arg0: i32, %arg1: i32) -> (i32, i32, i32) {
    %c0_i32 = arith.constant 0 : i32
    %c0_i32_0 = arith.constant 0 : i32
    return %arg0, %c0_i32, %arg1 : i32, i32, i32
  }
}

</mosaic_0001>

<bundles_post_ra>
// kernel: _forward_pool_conv_bn.1
= control target key start
LH: loop header
LB: loop body
LE: loop exit
PB: predicated region body
PF: predicated region fallthrough
CT: control target
= control target key end

     0   :  { %s527_s12 = smov 0   ;;  %s529_s13 = smov 0   ;;  %s592_s0 = inlined_call_operand.vmem [shape: f32[2,16,64], index: 0, kind: input, shape index: {}]   ;;  %s593_s1 = inlined_call_operand.vmem [shape: f32[32,16], index: 1, kind: input, shape index: {}]   ;;  %s594_s2 = inlined_call_operand.vmem [shape: f32[32,1], index: 2, kind: input, shape index: {}]   ;;  %s595_s3 = inlined_call_operand.vmem [shape: f32[2,32,64], index: 3, kind: output, shape index: {}]  }
   0x1   :  { %s531_s14 = smov 0  }
   0x2 LB: > { %s25_s15 = sadd.s32 1, %s500_s13  ;;  %p422_p0 = scmp.ge.s32.totalorder %s504_s14, 1  ;;  %s504_s14 = sphi %s531_s14, %s13_s14   ;;  %s500_s13 = sphi %s529_s13, %s597_s13   ;;  %s496_s12 = sphi %s527_s12, %s596_s12  }
   0x3   : > { %p27_p1 = scmp.ge.s32.totalorder %s25_s15, 2  ;;  %p156_p2 = scmp.lt.s32.totalorder %s504_s14, 3 }
   0x5   : > { %s599_s15 = smov (%p27_p1, %s25_s15), 0  ;;  %p157_p3 = pnand %p422_p0, %p156_p2 }
   0x6   : > { %p186_p4 = scmp.lt.s32.totalorder (!%p157_p3), %s496_s12, 1 }
   0x7   : > { %160 = sbr.rel (%p157_p3) target bundleno = 218 (0xda), region = 32 }
   0xc   : > { %v202_v0 = vld [vmem:[%s593_s1] sm:$0xff]  ;;  %vm232_vm0 = vcmask 130048   ;;  %v204_v1 = vld [vmem:[%s593_s1 + $0x10] sm:$0xff]  ;;  %s601_s12 = smov (!%p186_p4, %s496_s12), 1  ;;  %v506_v4 = vmov 0   ;;  %v203_v7 = vld [vmem:[%s593_s1 + $0x8] sm:$0xff] }
   0xd   : > { %445 = vmatprep.mubr.msk.f32.mxu0 %vm232_vm0, %v202_v0  ;;  %448 = vmatprep.mubr.msk.f32.mxu1 %vm232_vm0, %v204_v1  ;;  %v210_v2 = vld [vmem:[%s594_s2 + $0x10] sm:$0xff]  ;;  %v208_v3 = vld [vmem:[%s594_s2] sm:$0xff]  ;;  %s433_s24 = sshll.u32 %s601_s12, 4  ;;  %v205_v8 = vld [vmem:[%s593_s1 + $0x18] sm:$0xff]  ;;  %s434_s9 = sshll.u32 %s601_s12, 5  ;;  %vm330_vm1 = vcmask 523264  }
   0xe   : > { %481 = vset.pattern.permute.xlu1 %v506_v4  ;;  %480 = vset.pattern.permute.xlu0 %v506_v4  ;;  %s193_s27 = scalar_lea.vmem %s592_s0, %s433_s24  ;;  %v211_v9 = vld [vmem:[%s594_s2 + $0x18] sm:$0xff]  ;;  %v209_v10 = vld [vmem:[%s594_s2 + $0x8] sm:$0xff]  ;;  %s201_s16 = scalar_lea.vmem %s595_s3, %s434_s9 }
   0xf   : > { %224 = vperm.xlu1 %481, %v210_v2   ;;  %214 = vperm.xlu0 %480, %v208_v3   ;;  %v207_v5 = vld [vmem:[%s193_s27 + $0x8] sm:$0xff]  ;;  %v206_v6 = vld [vmem:[%s193_s27] sm:$0xff] }
  0x10   : > { %441 = vmatprep.subr.mxu0 %v207_v5  ;;  %451 = vmatprep.subr.mxu1 %v207_v5 }
  0x11   : > { %442 = vmatpush3.msra.mxu0 %v207_v5  ;;  %453 = vmatpush3.msra.mxu1 %v207_v5 }
  0x12   : > { %443 = vmatprep.subr.mxu0 %v206_v6  ;;  %452 = vmatprep.subr.mxu1 %v206_v6 }
  0x13   : > { %444 = vmatpush3.msra.mxu0 %v206_v6  ;;  %454 = vmatpush3.msra.mxu1 %v206_v6 }
  0x14   : > { %446 = vmatmul.mubr.msk.f32.vlgmr.msra.gmra.mxu0 %vm232_vm0, %v203_v7  ;;  %449 = vmatmul.mubr.msk.f32.vlgmr.msra.gmra.mxu1 %vm232_vm0, %v205_v8 }
  0x15   : > { %229 = vperm.xlu1 %481, %v211_v9   ;;  %219 = vperm.xlu0 %480, %v209_v10  }
  0x8a   : > { %v225_v11 = vpop.permute.xlu1 %224  ;;  %v215_v12 = vpop.permute.xlu0 %214 }
  0x90   : > { %v230_v13 = vpop.permute.xlu1 %229  ;;  %v220_v14 = vpop.permute.xlu0 %219 }
  0xd4   : > { %v447_v15 = vpop.f32.mrf.mxu0  ;;  %v450_v16 = vpop.f32.mrf.mxu1 }
  0xd5   : > { %v317_v17 = vadd.f32 %v447_v15, %v220_v14  ;;  %v327_v18 = vadd.f32 %v450_v16, %v230_v13 }
  0xd6   : > { %v311_v19 = vpop.f32.mrf.mxu0  ;;  %v321_v20 = vpop.f32.mrf.mxu1 }
  0xd7   : > { %332 = vst.msk [vmem:[%s201_s16 + $0x8] sm:$0xff] %vm330_vm1, %v317_v17  ;;  %334 = vst.msk [vmem:[%s201_s16 + $0x18] sm:$0xff] %vm330_vm1, %v327_v18  ;;  %v312_v21 = vadd.f32 %v311_v19, %v215_v12  ;;  %v322_v22 = vadd.f32 %v321_v20, %v225_v11 }
  0xd9   : > { %331 = vst.msk [vmem:[%s201_s16] sm:$0xff] %vm330_vm1, %v312_v21  ;;  %333 = vst.msk [vmem:[%s201_s16 + $0x10] sm:$0xff] %vm330_vm1, %v322_v22 }
  0xda PF: > { %s13_s14 = sadd.s32 1, %s504_s14   ;;  %s596_s12 = smov %s500_s13 }
  0xdb   : > { %p10_p5 = scmp.ge.s32.totalorder %s13_s14, 4   ;;  %s597_s13 = smov %s599_s15 }
  0xdd   :  { %12 = sbr.rel (!%p10_p5) target bundleno = 2 (0x2), region = 62 }

</bundles_post_ra>
